<compile_context>
chip_gen: v6e
topology: v6e:2x2x1
jax: 0.10.0
libtpu: 0.0.40
codegen_flags: <defaults>
</compile_context>

<pallas_src>
import functools

import jax
import jax.numpy as jnp
from jax.experimental import pallas as pl
from jax.experimental.pallas import tpu as pltpu


def _rope_kernel(x_ref, cos_ref, sneg_ref, o_ref, *, half, n_heads):
    # x_ref/o_ref: (TS, L) with L = n_heads * d_k (heads folded into lanes).
    # cos_ref/sneg_ref: (TS, D) per-head tables:
    #   cos_ext = [cos, cos, 1...]   (1 on the pass-through features)
    #   sin_neg = [-sin, 0..., 0...] (0 past the first half and on pass-through)
    x = x_ref[...].astype(jnp.float32)
    cos_d = cos_ref[...].astype(jnp.float32)
    sneg_d = sneg_ref[...].astype(jnp.float32)

    # Broadcast the per-head tables across heads along the lane axis (in-VMEM,
    # free relative to the HBM-bound DMA streams).
    if n_heads > 1:
        cos = jnp.tile(cos_d, (1, n_heads))
        sneg = jnp.tile(sneg_d, (1, n_heads))
    else:
        cos, sneg = cos_d, sneg_d

    L = x.shape[-1]
    lane = x.ndim - 1

    # Derive sin_pos from sin_neg: spos[l] = -sneg[(l - half) % L].  The wrapped
    # lanes land where sneg is exactly zero, so this is exact (saves a third
    # full table stream from HBM).  Roll uses the XLU slot (idle here).
    spos = -pltpu.roll(sneg, shift=half, axis=lane)

    # rotate_half via lane rolls:
    #   r_fwd[l] = x[(l + half) % L] -> pairs lane p with p+half ("-x2" term)
    #   r_bwd[l] = x[(l - half) % L] -> pairs lane p with p-half ("+x1" term)
    # Cross-head / wrap-around contamination only reaches lanes where the sin
    # tables are exactly zero, so full-axis rolls are safe.
    r_fwd = pltpu.roll(x, shift=(L - half) % L, axis=lane)
    r_bwd = pltpu.roll(x, shift=half, axis=lane)

    out = x * cos + r_fwd * sneg + r_bwd * spos
    o_ref[...] = out.astype(o_ref.dtype)


_TABLE_CACHE = {}


def _rope_tables(S, D, d_rope, base, offset):
    """Cached per-head tables of shape (S, D): cos_ext, sin_neg (float32)."""
    key = (int(S), int(D), int(d_rope), float(base), int(offset))
    hit = _TABLE_CACHE.get(key)
    if hit is not None:
        return hit

    half = d_rope // 2
    theta = 1.0 / (base ** (jnp.arange(0, d_rope, 2, dtype=jnp.float32) / d_rope))  # (half,)
    seq_idx = jnp.arange(offset, offset + S, dtype=jnp.float32)                     # (S,)
    idx_theta = seq_idx[:, None] * theta[None, :]                                   # (S, half)
    cos_h = jnp.cos(idx_theta)
    sin_h = jnp.sin(idx_theta)

    n_pass = D - d_rope
    cos_d = jnp.concatenate(
        [cos_h, cos_h, jnp.ones((S, n_pass), jnp.float32)], axis=-1)                # (S, D)
    sneg_d = jnp.concatenate(
        [-sin_h, jnp.zeros((S, half + n_pass), jnp.float32)], axis=-1)              # (S, D)

    cos_d = jax.block_until_ready(cos_d)
    sneg_d = jax.block_until_ready(sneg_d)
    _TABLE_CACHE[key] = (cos_d, sneg_d)
    return cos_d, sneg_d


def _vmem_limit_bytes():
    """Generation-aware VMEM limit (v7x has only 64 MiB per TensorCore)."""
    cap = 128 * 1024 * 1024
    try:
        info = pltpu.get_tpu_info()
        cap = int(getattr(info, "vmem_capacity_bytes", cap))
    except Exception:
        pass
    return int(min(cap // 2, 64 * 1024 * 1024))


def _pick_seq_tile(S, L, D, x_itemsize, budget_bytes):
    """Largest seq tile whose total double-buffered footprint fits the budget."""
    # per-row bytes: x in + x out + two f32 (S, D) tables; x2 for double buffering.
    bytes_per_row = 2 * L * x_itemsize + 2 * D * 4
    max_rows = max(8, budget_bytes // (2 * bytes_per_row))
    ts = min(int(max_rows), 1024)  # diminishing returns past ~1K rows
    if ts >= S:
        return S                   # single full-extent block (always legal)
    return max(8, (ts // 8) * 8)   # (8,128)-friendly; cdiv grid handles the tail


def rope_forward(x, d_rope: int, base: float = 10000.0, offset: int = 0):
    """x: [batch, seq, n_heads, d_k]. Applies GPT-NeoX RoPE to the first d_rope features."""
    B, S, H, D = x.shape
    assert d_rope % 2 == 0 and 0 < d_rope <= D
    half = d_rope // 2
    L = H * D

    cos_t, sneg_t = _rope_tables(S, D, d_rope, base, offset)

    # Fold heads into the lane axis (free, trailing-dim reshape) -> lane-dense I/O.
    x_flat = x.reshape(B, S, L)

    vmem_limit = _vmem_limit_bytes()
    TS = _pick_seq_tile(S, L, D, x.dtype.itemsize, budget_bytes=vmem_limit // 2)
    num_s = pl.cdiv(S, TS)

    kernel = functools.partial(_rope_kernel, half=half, n_heads=H)

    out = pl.pallas_call(
        kernel,
        out_shape=jax.ShapeDtypeStruct((B, S, L), x.dtype),
        grid=(num_s, B),  # seq tiles outer, batch inner -> table blocks reused across batch
        in_specs=[
            # batch dim squeezed (None) so the kernel works on a clean 2-D lane-dense tile
            pl.BlockSpec((None, TS, L), lambda si, bi: (bi, si, 0)),  # x
            pl.BlockSpec((TS, D), lambda si, bi: (si, 0)),            # cos_ext  (per-head)
            pl.BlockSpec((TS, D), lambda si, bi: (si, 0)),            # sin_neg (per-head)
        ],
        out_specs=pl.BlockSpec((None, TS, L), lambda si, bi: (bi, si, 0)),
        compiler_params=pltpu.CompilerParams(
            dimension_semantics=("parallel", "parallel"),
            vmem_limit_bytes=vmem_limit,
        ),
    )(x_flat, cos_t, sneg_t)

    return out.reshape(B, S, H, D)


def rope_reference(x, d_rope: int, base: float = 10000.0, offset: int = 0):
    """Pure-JAX reference matching the PyTorch module semantics."""
    B, S, H, D = x.shape
    theta = 1.0 / (base ** (jnp.arange(0, d_rope, 2, dtype=jnp.float32) / d_rope))
    seq_idx = jnp.arange(offset, S + offset, dtype=jnp.float32)
    idx_theta = jnp.einsum("s,d->sd", seq_idx, theta)
    idx_theta2 = jnp.concatenate([idx_theta, idx_theta], axis=-1)
    cos = jnp.cos(idx_theta2)[None, :, None, :]
    sin = jnp.sin(idx_theta2)[None, :, None, :]
    xf = x.astype(jnp.float32)
    x_rope, x_pass = xf[..., :d_rope], xf[..., d_rope:]
    half = d_rope // 2
    x1, x2 = x_rope[..., :half], x_rope[..., half:]
    rotated = jnp.concatenate([-x2, x1], axis=-1)
    x_rope = x_rope * cos + rotated * sin
    return jnp.concatenate([x_rope, x_pass], axis=-1)


if __name__ == "__main__":
    key = jax.random.PRNGKey(0)
    batch, seq, n_heads, d_k = 2, 8, 4, 32

    x = jax.random.normal(key, (batch, seq, n_heads, d_k), dtype=jnp.float32)

    # Partial RoPE (d_rope < d_k), full RoPE (d_rope == d_k), and a nonzero offset.
    for d_rope, offset in ((16, 0), (d_k, 0), (16, 3)):
        out = jax.block_until_ready(rope_forward(x, d_rope=d_rope, base=10000.0, offset=offset))
        ref = rope_reference(x, d_rope=d_rope, base=10000.0, offset=offset)
        assert out.shape == x.shape and out.dtype == x.dtype
        assert jnp.allclose(out, ref, atol=1e-5, rtol=1e-5), (
            f"mismatch vs reference (d_rope={d_rope}, offset={offset})")

    # bf16 activations: kernel upcasts to f32 internally, stores back as bf16.
    x_bf16 = x.astype(jnp.bfloat16)
    out_bf16 = jax.block_until_ready(rope_forward(x_bf16, d_rope=16))
    ref_bf16 = rope_reference(x_bf16, d_rope=16)
    assert out_bf16.dtype == jnp.bfloat16
    assert jnp.allclose(out_bf16.astype(jnp.float32), ref_bf16, atol=5e-2, rtol=5e-2), \
        "bf16 mismatch vs reference"

    print("KERNEL_OK")
</pallas_src>

<mosaic_0001>
module attributes {stable_mosaic.version = 11 : i64} {
  func.func @_rope_kernel(%arg0: i32, %arg1: i32, %arg2: memref<1x8x128xf32, #tpu.memory_space<vmem>>, %arg3: memref<8x32xf32, #tpu.memory_space<vmem>>, %arg4: memref<8x32xf32, #tpu.memory_space<vmem>>, %arg5: memref<1x8x128xf32, #tpu.memory_space<vmem>>) attributes {dimension_semantics = [#tpu.dimension_semantics<parallel>, #tpu.dimension_semantics<parallel>], iteration_bounds = array<i64: 1, 2>, scalar_prefetch = 0 : i64, scratch_operands = 0 : i64, tpu.core_type = #tpu.core_type<tc>, window_params = [{transform_indices = @transform_0, window_bounds = array<i64: 1, 8, 128>}, {transform_indices = @transform_1, window_bounds = array<i64: 8, 32>}, {transform_indices = @transform_2, window_bounds = array<i64: 8, 32>}, {transform_indices = @transform_3, window_bounds = array<i64: 1, 8, 128>}]} {
    %c0 = arith.constant 0 : index
    %c0_0 = arith.constant 0 : index
    %c0_1 = arith.constant 0 : index
    %0 = vector.load %arg2[%c0, %c0_0, %c0_1] : memref<1x8x128xf32, #tpu.memory_space<vmem>>, vector<1x8x128xf32>
    %1 = vector.shape_cast %0 : vector<1x8x128xf32> to vector<8x128xf32>
    %c0_2 = arith.constant 0 : index
    %c0_3 = arith.constant 0 : index
    %2 = vector.load %arg3[%c0_2, %c0_3] : memref<8x32xf32, #tpu.memory_space<vmem>>, vector<8x32xf32>
    %c0_4 = arith.constant 0 : index
    %c0_5 = arith.constant 0 : index
    %3 = vector.load %arg4[%c0_4, %c0_5] : memref<8x32xf32, #tpu.memory_space<vmem>>, vector<8x32xf32>
    %4 = tpu.concatenate %2, %2, %2, %2 in 1 : vector<8x32xf32>, vector<8x32xf32>, vector<8x32xf32>, vector<8x32xf32> -> vector<8x128xf32>
    %5 = tpu.concatenate %3, %3, %3, %3 in 1 : vector<8x32xf32>, vector<8x32xf32>, vector<8x32xf32>, vector<8x32xf32> -> vector<8x128xf32>
    %c8_i32 = arith.constant 8 : i32
    %6 = tpu.dynamic_rotate %5 by %c8_i32 dim 1 : vector<8x128xf32>, i32 -> vector<8x128xf32>
    %cst = arith.constant 0.000000e+00 : f32
    %7 = vector.broadcast %cst : f32 to vector<8x128xf32>
    %8 = arith.subf %7, %6 : vector<8x128xf32>
    %c120_i32 = arith.constant 120 : i32
    %9 = tpu.dynamic_rotate %1 by %c120_i32 dim 1 : vector<8x128xf32>, i32 -> vector<8x128xf32>
    %c8_i32_6 = arith.constant 8 : i32
    %10 = tpu.dynamic_rotate %1 by %c8_i32_6 dim 1 : vector<8x128xf32>, i32 -> vector<8x128xf32>
    %11 = arith.mulf %1, %4 : vector<8x128xf32>
    %12 = arith.mulf %9, %5 : vector<8x128xf32>
    %13 = arith.addf %11, %12 : vector<8x128xf32>
    %14 = arith.mulf %10, %8 : vector<8x128xf32>
    %15 = arith.addf %13, %14 : vector<8x128xf32>
    %c0_7 = arith.constant 0 : index
    %c0_8 = arith.constant 0 : index
    %c0_9 = arith.constant 0 : index
    %16 = vector.load %arg5[%c0_7, %c0_8, %c0_9] : memref<1x8x128xf32, #tpu.memory_space<vmem>>, vector<1x8x128xf32>
    %17 = vector.shape_cast %16 : vector<1x8x128xf32> to vector<8x128xf32>
    %18 = vector.shape_cast %15 : vector<8x128xf32> to vector<1x8x128xf32>
    tpu.vector_store %arg5[%c0_7, %c0_8, %c0_9], %18 {strides = array<i32>} : memref<1x8x128xf32, #tpu.memory_space<vmem>>, vector<1x8x128xf32>,
    return
  }
  func.func @transform_0(%arg0: i32, %arg1: i32) -> (i32, i32, i32) {
    %c0_i32 = arith.constant 0 : i32
    %c0_i32_0 = arith.constant 0 : i32
    return %arg1, %arg0, %c0_i32 : i32, i32, i32
  }
  func.func @transform_1(%arg0: i32, %arg1: i32) -> (i32, i32) {
    %c0_i32 = arith.constant 0 : i32
    %c0_i32_0 = arith.constant 0 : i32
    return %arg0, %c0_i32 : i32, i32
  }
  func.func @transform_2(%arg0: i32, %arg1: i32) -> (i32, i32) {
    %c0_i32 = arith.constant 0 : i32
    %c0_i32_0 = arith.constant 0 : i32
    return %arg0, %c0_i32 : i32, i32
  }
  func.func @transform_3(%arg0: i32, %arg1: i32) -> (i32, i32, i32) {
    %c0_i32 = arith.constant 0 : i32
    %c0_i32_0 = arith.constant 0 : i32
    return %arg1, %arg0, %c0_i32 : i32, i32, i32
  }
}

</mosaic_0001>

<bundles_post_ra>
// kernel: tpu_custom_call.1
= control target key start
LH: loop header
LB: loop body
LE: loop exit
PB: predicated region body
PF: predicated region fallthrough
CT: control target
= control target key end

     0   :  { %8 = vsyncpa [#allocation3], 0  ;;  %s883_s0 = inlined_call_operand.hbm [shape: f32[2,8,128], index: 0, kind: input, shape index: {}]   ;;  %s884_s1 = inlined_call_operand.hbm [shape: f32[8,32], index: 1, kind: input, shape index: {}]   ;;  %s885_s2 = inlined_call_operand.hbm [shape: f32[8,32], index: 2, kind: input, shape index: {}]   ;;  %s886_s3 = inlined_call_operand.hbm [shape: f32[2,8,128], index: 3, kind: output, shape index: {}]  }
   0x1   :  { %10 = vsyncpa [#allocation3 + $0x1], 0 }
   0x2   :  { %11 = vsyncpa [#allocation6], 0 }
   0x3   :  { %12 = vsyncpa [#allocation4], 0 }
   0x4   :  { %14 = vsyncpa [#allocation4 + $0x1], 0  ;;  %s705_s12 = smov 0   ;;  %s707_s13 = smov 0  }
   0x5   :  { %s709_s14 = smov 0   ;;  %s711_s15 = smov 0  }
   0x6   :  { %s713_s16 = smov 0   ;;  %s715_s17 = smov 0  }
   0x7 LB: > { %s405_s18 = sadd.s32 4294967295, %s674_s17   ;;  %s406_s19 = sadd.s32 4294967294, %s674_s17   ;;  %s674_s17 = sphi %s715_s17, %s20_s17   ;;  %s670_s16 = sphi %s713_s16, %s909_s16   ;;  %s666_s15 = sphi %s711_s15, %s908_s15   ;;  %s662_s14 = sphi %s709_s14, %s907_s14   ;;  %s658_s13 = sphi %s707_s13, %s906_s13   ;;  %s654_s12 = sphi %s705_s12, %s905_s12  }
   0x8   : > { %p54_p0 = scmp.ne.s32.totalorder %s658_s13, %s654_s12  ;;  %p739_p1 = scmp.eq.s32.totalorder %s405_s18, 0 }
   0x9   : > { %p743_p2 = scmp.eq.s32.totalorder %s405_s18, 1  ;;  %p138_p3 = scmp.eq.s32.totalorder %s406_s19, 1 }
   0xa   : > { %s891_s20 = scalar_select %p739_p1, 1, 0 }
   0xb   : > { %s892_s21 = scalar_select %p743_p2, 1, 0 }
   0xc   : > { %p749_p4 = por %p739_p1, %p54_p0  ;;  %p407_p5 = scmp.ge.s32.totalorder %s674_s17, 1 }
   0xd   : > { %p754_p6 = por %p138_p3, %p54_p0  ;;  %p145_p7 = scmp.lt.s32.totalorder %s674_s17, 3 }
   0xe   : > { %s893_s22 = scalar_select %p749_p4, 1, 0 }
   0xf   : > { %s894_s23 = scalar_select %p754_p6, 1, 0 }
  0x10   : > { %p759_p8 = pnand %p407_p5, %p145_p7  ;;  %s676_s25 = smov [#allocation5]  }
  0x11   : > { %s160_s26 = sshll.u32 %s676_s25, 4  ;;  %s677_s27 = smov [#allocation7]   ;;  %s161_s26 = int_to_ptr.vmem [resolvable:$true] %s160_s26 }
  0x12   : > { %s895_s24 = scalar_select %p759_p8, 1, 0 }
  0x13   : > { %p434_p10 = pneg %p759_p8  ;;  %s173_s28 = sshll.u32 %s677_s27, 4  ;;  %s174_s28 = int_to_ptr.vmem [resolvable:$true] %s173_s28 }
  0x14   : > { %s521_s30 = scalar_lea.vmem %s161_s26, 128  ;;  %p529_p5 = scmp.lt.s32.totalorder %s161_s26, %s161_s26 }
  0x15   : > { %p768_p11 = pnand %p434_p10, %p739_p1  ;;  %p522_p13 = scmp.ne.s32.totalorder %s161_s26, %s521_s30 }
  0x16   : > { %p530_p7 = scmp.lt.s32.totalorder %s521_s30, %s521_s30 }
  0x17   : > { %p512_p12 = pneg %p768_p11 }
  0x18   : > { %p531_p9 = por %p530_p7, %p529_p5 }
  0x19   : > { %p524_p0 = pnand %p522_p13, %p512_p12 }
  0x1b   : > { %p525_p3 = pneg %p524_p0 }
  0x1d   : > { %p532_p6 = pnand %p531_p9, %p525_p3 }
  0x1f   : > { %535 = shalt.err (!%p532_p6)
}
  0x20   : > { %437 = dma.hbm_to_vmem [thread:$0]  (!%p768_p11), %s884_s1, 128, %s161_s26, [#allocation6]  }
  0x21   : > { %s547_s6 = scalar_lea.vmem %s174_s28, 128  ;;  %p555_p13 = scmp.lt.s32.totalorder %s174_s28, %s174_s28 }
  0x22   : > { %p548_p10 = scmp.ne.s32.totalorder %s174_s28, %s547_s6  ;;  %p556_p0 = scmp.lt.s32.totalorder %s547_s6, %s547_s6 }
  0x24   : > { %p550_p1 = pnand %p548_p10, %p512_p12  ;;  %p557_p8 = por %p556_p0, %p555_p13 }
  0x26   : > { %p551_p4 = pneg %p550_p1 }
  0x28   : > { %p558_p2 = pnand %p557_p8, %p551_p4 }
  0x2a   : > { %561 = shalt.err (!%p558_p2)
}
  0x2b   : > { %440 = dma.hbm_to_vmem [thread:$0]  (!%p768_p11), %s885_s2, 128, %s174_s28, [#allocation6]  }
  0x2c   : > { %s29_s9 = sadd.s32 1, %s670_s16  ;;  %s41_s10 = sadd.s32 1, %s662_s14 }
  0x2d   : > { %p30_p1 = scmp.ge.s32.totalorder %s29_s9, 2  ;;  %p48_p2 = scmp.ne.s32.totalorder %s662_s14, %s658_s13 }
  0x2e   : > { %p49_p4 = scmp.eq.s32.totalorder %s674_s17, 0  ;;  %p451_p6 = scmp.lt.s32.totalorder %s674_s17, 2 }
  0x2f   : > { %s911_s9 = smov (%p30_p1, %s29_s9), 0  ;;  %p897_p9 = scmp.ne.s32.totalorder %s892_s21, 0 }
  0x30   : > { %p50_p8 = por %p49_p4, %p48_p2  ;;  %s36_s18 = ssub.s32 %s670_s16, %s911_s9 }
  0x31   : > { %p800_p12 = por %p897_p9, %p48_p2  ;;  %s184_s19 = sand.u32 1, %s662_s14  }
  0x32   : > { %p39_p3 = scmp.eq.s32.totalorder %s36_s18, 0  ;;  %s411_s25 = sshll.u32 %s184_s19, 3 }
  0x33   : > { %s412_s26 = sshll.u32 %s670_s16, 7  ;;  %s188_s4 = scalar_lea.vmem [#allocation2], %s411_s25 }
  0x34   : > { %s809_s27 = scalar_select %p39_p3, %s662_s14, %s41_s10  }
  0x35   : > { %s194_s30 = scalar_lea.hbm %s883_s0, %s412_s26  ;;  %s196_s5 = sshll.u32 %s188_s4, 4  ;;  %s197_s5 = int_to_ptr.vmem [resolvable:$true] %s196_s5 }
  0x36   : > { %p816_p11 = pnand %p451_p6, %p50_p8  ;;  %s185_s6 = scalar_lea.sflag [#allocation3], %s184_s19 }
  0x37   : > { %s575_s7 = scalar_lea.vmem %s197_s5, 128  ;;  %s678_s8 = smov [#allocation2]  }
  0x38   : > { %p564_p5 = pneg %p816_p11  ;;  %p576_p7 = scmp.ne.s32.totalorder %s197_s5, %s575_s7 }
  0x39   : > { %s580_s10 = sshll.u32 %s678_s8, 4  ;;  %s581_s10 = int_to_ptr.vmem [resolvable:$false] %s580_s10 }
  0x3a   : > { %p578_p10 = pnand %p576_p7, %p564_p5  ;;  %s582_s18 = scalar_lea.vmem %s581_s10, 256 }
  0x3b   : > { %p583_p0 = scmp.lt.s32.totalorder %s197_s5, %s581_s10  ;;  %p584_p1 = scmp.lt.s32.totalorder %s582_s18, %s575_s7 }
  0x3c   : > { %p579_p13 = pneg %p578_p10 }
  0x3d   : > { %p585_p2 = por %p584_p1, %p583_p0 }
  0x3f   : > { %p586_p4 = pnand %p585_p2, %p579_p13 }
  0x41   : > { %589 = shalt.err (!%p586_p4)
}
  0x42   : > { %444 = dma.hbm_to_vmem [thread:$0]  (!%p816_p11), %s194_s30, 128, %s197_s5, %s185_s6  }
  0x43   : > { %p900_p6 = scmp.ne.s32.totalorder %s895_s24, 0 }
  0x44   : > { %s827_s19 = sand.u32 (!%p900_p6), 1, %s658_s13   ;;  %p901_p8 = scmp.ne.s32.totalorder (!%p900_p6), %s893_s22, 0 }
  0x45   : > { %205 = sbr.rel (%p900_p6) target bundleno = 336 (0x150), region = 32  ;;  %s414_s25 = sshll.u32 (!%p900_p6), %s827_s19, 3 }
  0x46   : > { %s208_s26 = scalar_lea.sflag (!%p900_p6), [#allocation3], %s827_s19  ;;  %s211_s28 = scalar_lea.vmem (!%p900_p6), [#allocation2], %s414_s25 }
  0x4a   : > { %641 = dma.done.wait (%p901_p8), %s208_s26, 128  }
  0x4b   : > { %643 = vsyncadd (%p901_p8), %s208_s26, 4294967168  ;;  %p902_p9 = scmp.ne.s32.totalorder %s891_s20, 0 }
  0x4d   : > { %645 = dma.done.wait (%p902_p9), [#allocation6], 256  }
  0x4e   : > { %647 = vsyncadd (%p902_p9), [#allocation6], 4294967040  ;;  %v244_v0 = vld [vmem:[#allocation7] sm:$0xff]  ;;  %s679_s24 = smov 96   ;;  %s680_s29 = smov 32   ;;  %v243_v1 = vld [vmem:[#allocation5] sm:$0xff] }
  0x4f   : > { %268 = vrot.lane.b32.xlu1 %v244_v0, %s679_s24  ;;  %262 = vrot.lane.b32.xlu0 %v244_v0, %s680_s29  ;;  %s681_s30 = smov 64   ;;  %v242_v2 = vld [vmem:[%s211_s28] sm:$0xff]  ;;  %s682_s22 = smov 120   ;;  %vm255_vm0 = vcmask 261120   ;;  %vm257_vm1 = vcmask 523264   ;;  %vm259_vm2 = vcmask 785408  }
  0x50   : > { %s683_s20 = smov 8   ;;  %s419_s4 = sshll.u32 %s666_s15, 7 }
  0x51   : > { %s241_s5 = scalar_lea.vmem [#allocation8], %s414_s25  ;;  %s300_s8 = scalar_lea.hbm %s886_s3, %s419_s4 }
  0x52   : > { %s302_s21 = sshll.u32 %s241_s5, 4  ;;  %s288_s10 = scalar_lea.sflag [#allocation4], %s827_s19  ;;  %s303_s21 = int_to_ptr.vmem [resolvable:$true] %s302_s21 }
  0x53   : > { %265 = vrot.lane.b32.xlu0 %v244_v0, %s681_s30  ;;  %246 = vrot.lane.b32.xlu1 %v243_v1, %s680_s29  ;;  %s590_s18 = scalar_lea.vmem %s303_s21, 128  ;;  %s684_s26 = smov [#allocation8]  }
  0x54   : > { %p591_p3 = scmp.ne.s32.totalorder %s303_s21, %s590_s18  ;;  %s594_s28 = sshll.u32 %s684_s26, 4  ;;  %s595_s28 = int_to_ptr.vmem [resolvable:$false] %s594_s28 }
  0x55   : > { %s596_s15 = scalar_lea.vmem %s595_s28, 256  ;;  %p597_p7 = scmp.lt.s32.totalorder %s303_s21, %s595_s28 }
  0x56   : > { %p592_p11 = pnand %p591_p3, %p800_p12  ;;  %p598_p10 = scmp.lt.s32.totalorder %s596_s15, %s590_s18 }
  0x57   : > { %252 = vrot.lane.b32.xlu1 %v243_v1, %s679_s24  ;;  %249 = vrot.lane.b32.xlu0 %v243_v1, %s681_s30 }
  0x58   : > { %p593_p5 = pneg %p592_p11  ;;  %p599_p13 = por %p598_p10, %p597_p7 }
  0x5a   : > { %p600_p0 = pnand %p599_p13, %p593_p5 }
  0x5b   : > { %277 = vrot.lane.b32.xlu1 %v242_v2, %s682_s22 }
  0xc1   : > { %v269_v3 = vpop.permute.xlu1 %268  ;;  %v263_v4 = vpop.permute.xlu0 %262 }
  0xc2   : > { %v271_v5 = vsel %vm255_vm0, %v244_v0, %v263_v4 }
  0xc5   : > { %v266_v6 = vpop.permute.xlu0 %265  ;;  %v247_v7 = vpop.permute.xlu1 %246 }
  0xc6   : > { %v272_v8 = vsel %vm257_vm1, %v271_v5, %v266_v6  ;;  %v256_v9 = vsel %vm255_vm0, %v243_v1, %v247_v7 }
  0xc7   : > { %v273_v10 = vsel %vm259_vm2, %v272_v8, %v269_v3 }
  0xc8   : > { %274 = vrot.lane.b32.xlu0 %v273_v10, %s683_s20 }
  0xc9   : > { %v253_v11 = vpop.permute.xlu1 %252  ;;  %v250_v12 = vpop.permute.xlu0 %249 }
  0xca   : > { %v258_v13 = vsel %vm257_vm1, %v256_v9, %v250_v12 }
  0xcb   : > { %v260_v14 = vsel %vm259_vm2, %v258_v13, %v253_v11 }
  0xcc   : > { %279 = vrot.lane.b32.xlu0 %v242_v2, %s683_s20  ;;  %v281_v15 = vmul.f32 %v260_v14, %v242_v2 }
  0xcd   : > { %v278_v16 = vpop.permute.xlu1 %277 }
  0xce   : > { %v282_v17 = vmul.f32 %v278_v16, %v273_v10 }
  0xd0   : > { %v283_v18 = vadd.f32 %v282_v17, %v281_v15 }
 0x13a   : > { %v275_v19 = vpop.permute.xlu0 %274 }
 0x13b   : > { %v276_v20 = vsub.f32 0.0, %v275_v19 }
 0x13e   : > { %v280_v21 = vpop.permute.xlu0 %279 }
 0x13f   : > { %v284_v22 = vmul.f32 %v280_v21, %v276_v20 }
 0x141   : > { %v285_v23 = vadd.f32 %v284_v22, %v283_v18 }
 0x143   : > { %286 = vst [vmem:[%s241_s5] sm:$0xff] %v285_v23 }
 0x144   : > { %603 = shalt.err (!%p600_p0)
}
 0x145   : > { %s604_s25 = scalar_lea.hbm %s300_s8, 128  ;;  %s608_s29 = scalar_lea.hbm %s886_s3, 256 }
 0x146   : > { %p605_p1 = scmp.ne.s32.totalorder %s300_s8, %s604_s25  ;;  %p609_p6 = scmp.lt.s32.totalorder %s300_s8, %s886_s3 }
 0x147   : > { %p610_p8 = scmp.lt.s32.totalorder %s608_s29, %s604_s25 }
 0x148   : > { %p606_p2 = pnand %p605_p1, %p800_p12 }
 0x149   : > { %p611_p9 = por %p610_p8, %p609_p6 }
 0x14a   : > { %p607_p4 = pneg %p606_p2 }
 0x14c   : > { %p612_p3 = pnand %p611_p9, %p607_p4 }
 0x14e   : > { %615 = shalt.err (!%p612_p3)
}
 0x14f   : > { %432 = dma.vmem_to_hbm [thread:$0]  (%p800_p12), %s303_s21, 128, %s300_s8, %s288_s10  }
 0x150 PF: > { %s314_s20 = sand.u32 1, %s654_s12   ;;  %p903_p11 = scmp.ne.s32.totalorder %s894_s23, 0 }
 0x151   : > { %p904_p5 = scmp.ge.s32.totalorder %s674_s17, 2  ;;  %s315_s4 = scalar_lea.sflag [#allocation4], %s314_s20 }
 0x153   : > { %p446_p7 = pnand %p904_p5, %p903_p11 }
 0x155   : > { %p447_p10 = pneg %p446_p7 }
 0x157   : > { %649 = dma.done.wait (%p447_p10), %s315_s4, 128  }
 0x158   : > { %651 = vsyncadd (%p447_p10), %s315_s4, 4294967168  ;;  %s20_s17 = sadd.s32 1, %s674_s17   ;;  %s905_s12 = smov %s658_s13 }
 0x159   : > { %p17_p13 = scmp.ge.s32.totalorder %s20_s17, 4   ;;  %s906_s13 = smov %s662_s14 }
 0x15a   : > { %s907_s14 = smov %s809_s27  ;;  %s908_s15 = smov %s670_s16 }
 0x15b   : > { %s909_s16 = smov %s911_s9  ;;  %19 = sbr.rel (!%p17_p13) target bundleno = 7 (0x7), region = 87 }
 0x160   :  { %320 = vsyncpa [#allocation3], 1 }
 0x161   :  { %322 = vsyncpa [#allocation3 + $0x1], 1 }
 0x162   :  { %323 = vsyncpa [#allocation6], 1 }
 0x163   :  { %324 = vsyncpa [#allocation4], 1 }
 0x164   :  { %326 = vsyncpa [#allocation4 + $0x1], 1 }

</bundles_post_ra>
